<compile_context>
chip_gen: v5e
topology: v5e:2x2
jax: 0.10.0
libtpu: 0.0.40
codegen_flags: <defaults>
</compile_context>

<pallas_src>
import functools
import math

import jax
import jax.numpy as jnp
from jax import lax
from jax.experimental import pallas as pl
from jax.experimental.pallas import tpu as pltpu


# --------------------------------------------------------------------------- #
# VMEM budgeting (generation-aware).
# --------------------------------------------------------------------------- #
def _tpu_vmem_capacity():
    try:
        return int(pltpu.get_tpu_info().vmem_capacity_bytes)
    except Exception:
        return None


def _vmem_budget():
    cap = _tpu_vmem_capacity()
    if cap is None:
        return 24 * 1024 * 1024                      # conservative fallback
    # ~half of physical VMEM: 64 MiB on v5e/v6e (128 MiB), 32 MiB on v7x (64 MiB)
    return max(cap // 2, 16 * 1024 * 1024)


def _vmem_limit_bytes():
    cap = _tpu_vmem_capacity()
    if cap is None:
        return None
    return min((cap * 3) // 4, 96 * 1024 * 1024)


def _per_head_bytes(C, L, tq, blk_dsize, out_dsize, kv_buffers=2):
    """Rough per-head VMEM footprint of one grid step."""
    q_blocks = 2 * C * tq * blk_dsize                 # double-buffered q block
    o_blocks = 2 * C * tq * out_dsize                 # double-buffered out block
    kv_blocks = 2 * kv_buffers * C * L * blk_dsize    # k and v blocks
    scores = tq * L * (4 + 4 + blk_dsize)             # f32 scores + exp + cast probs
    acc = C * tq * 4                                  # f32 PV result
    return q_blocks + o_blocks + kv_blocks + scores + acc


def _choose_tiles(H, C, L, blk_dsize, out_dsize, budget):
    """Pick (heads per step G, query tile TQ, K/V pipeline depth)."""
    # Query tile must be a multiple of 128 or the full length L; prefer growing
    # TQ before growing G (more K/V reuse per fetch, fewer exposed DMAs).
    if L % 128 == 0:
        tq_cands = [c for c in (L, 8192, 4096, 2048, 1024, 512, 256, 128)
                    if c <= L and L % c == 0]
        tq_cands = list(dict.fromkeys(tq_cands))
    else:
        tq_cands = [L]        # non-aligned L: the block must span the whole axis
    tq = tq_cands[-1]
    for cand in tq_cands:
        if _per_head_bytes(C, L, cand, blk_dsize, out_dsize) <= budget:
            tq = cand
            break
    # TODO(synk): for very large L (>= ~4-8K on v7x's 64 MiB VMEM) switch to a
    # flash-style online-softmax KV-tile loop instead of whole-row softmax.

    per_head = max(_per_head_bytes(C, L, tq, blk_dsize, out_dsize), 1)
    g = max(1, min(H, budget // per_head, 16))
    while H % g:
        g -= 1

    kv_buffers = 2
    if g * _per_head_bytes(C, L, tq, blk_dsize, out_dsize, kv_buffers=3) <= budget:
        kv_buffers = 3
    return g, tq, kv_buffers


def _block_spec(block_shape, index_map, buffers=2):
    if buffers > 2:
        try:
            return pl.BlockSpec(block_shape, index_map,
                                pipeline_mode=pl.Buffered(buffers))
        except TypeError:      # older jax without pipeline_mode support
            pass
    return pl.BlockSpec(block_shape, index_map)


# --------------------------------------------------------------------------- #
# Kernel.
# --------------------------------------------------------------------------- #
def _attn_kernel(q_ref, k_ref, v_ref, o_ref, *, scale):
    # q_ref: (G, C, TQ)    k_ref, v_ref: (G, C, L)    o_ref: (G, C, TQ)
    q = q_ref[...]
    k = k_ref[...]
    v = v_ref[...]
    # Scale only q by 1/sqrt(C) (== the torch per-operand scale squared);
    # accumulation is f32 so the fp16-overflow trick is unnecessary.
    q = q * jnp.asarray(scale, q.dtype)

    # w[g, t, s] = sum_c q[g, c, t] * k[g, c, s]   (f32 MXU accumulation).
    # NOTE: contraction-dim dot_general; if pl.lower_as_mlir ever shows an XLU
    # relayout of the q tile here, flip lhs/rhs to compute (L, TQ) scores.
    w = lax.dot_general(q, k, (((1,), (1,)), ((0,), (0,))),
                        preferred_element_type=jnp.float32)       # (G, TQ, L)

    # Numerically-stable softmax numerator in f32; normalization is deferred
    # past the PV matmul so we never run an extra pass over the (TQ, L) tile.
    w = jnp.exp(w - jnp.max(w, axis=-1, keepdims=True))
    denom = jnp.sum(w, axis=-1)                                   # (G, TQ) f32
    p = w.astype(v.dtype)                                         # probs for PV

    # a[g, c, t] = sum_s v[g, c, s] * p[g, t, s]   (no p.T materialized)
    a = lax.dot_general(v, p, (((2,), (2,)), ((0,), (0,))),
                        preferred_element_type=jnp.float32)       # (G, C, TQ)

    # Deferred normalization on the small (G, C, TQ) result; exact reciprocal
    # (approx=False) so rows sum to 1 at f32 precision (fixes the 2e-3 miss).
    inv = pl.reciprocal(denom, approx=False)                      # (G, TQ)
    o_ref[...] = (a * inv[:, None, :]).astype(o_ref.dtype)


# --------------------------------------------------------------------------- #
# Wrapper.
# --------------------------------------------------------------------------- #
def qkv_attention(qkv, num_heads, *, matmul_dtype=jnp.bfloat16):
    """Pallas implementation of QKVAttention.forward.

    qkv: (B, 3*num_heads*C, L).  Returns (B, num_heads*C, L) in qkv.dtype.
    matmul_dtype: MXU compute dtype (default bf16; softmax stays f32).  Pass
      None / jnp.float32 for exact f32 matmuls.
    """
    B, width, L = qkv.shape
    assert width % (3 * num_heads) == 0
    H = num_heads
    C = width // (3 * H)
    out_dtype = qkv.dtype
    scale = 1.0 / math.sqrt(C)          # == (1/C**0.25)**2 from the torch code

    if matmul_dtype is not None and \
            jnp.dtype(matmul_dtype).itemsize < jnp.dtype(out_dtype).itemsize:
        compute_dtype = jnp.dtype(matmul_dtype)
    else:
        compute_dtype = jnp.dtype(out_dtype)
    blk_dsize = compute_dtype.itemsize
    out_dsize = jnp.dtype(out_dtype).itemsize

    budget = _vmem_budget()
    g, tq, kv_buffers = _choose_tiles(H, C, L, blk_dsize, out_dsize, budget)
    # Deeper K/V buffering only pays off when there is more than one K/V block
    # transition (b/h boundary) to hide.
    if B * (H // g) <= 2:
        kv_buffers = 2

    # Free contiguous reshape; cast to the MXU dtype at the boundary (halves
    # K/V HBM DMA + VMEM when bf16).  The same array is passed 3x below so
    # q/k/v are never split/copied separately.
    x = qkv.reshape(B, 3, H, C, L).astype(compute_dtype)

    grid = (B, H // g, L // tq)

    q_spec = pl.BlockSpec((None, None, g, C, tq), lambda b, h, t: (b, 0, h, 0, t))
    k_spec = _block_spec((None, None, g, C, L), lambda b, h, t: (b, 1, h, 0, 0),
                         buffers=kv_buffers)
    v_spec = _block_spec((None, None, g, C, L), lambda b, h, t: (b, 2, h, 0, 0),
                         buffers=kv_buffers)
    o_spec = pl.BlockSpec((None, g, C, tq), lambda b, h, t: (b, h, 0, t))

    flops = 4 * B * H * C * L * L                 # QK^T + PV
    transcendentals = B * H * L * L               # exp
    bytes_accessed = B * H * C * L * (3 * blk_dsize + out_dsize)

    out = pl.pallas_call(
        functools.partial(_attn_kernel, scale=scale),
        out_shape=jax.ShapeDtypeStruct((B, H, C, L), out_dtype),
        grid=grid,
        in_specs=[q_spec, k_spec, v_spec],
        out_specs=o_spec,
        compiler_params=pltpu.CompilerParams(
            # Query-tile axis "arbitrary": on dual-TC v7x the megacore split
            # stays on B/H, so each K/V block is resident on exactly one core.
            dimension_semantics=("parallel", "parallel", "arbitrary"),
            vmem_limit_bytes=_vmem_limit_bytes(),
        ),
        cost_estimate=pl.CostEstimate(
            flops=flops,
            transcendentals=transcendentals,
            bytes_accessed=bytes_accessed,
        ),
    )(x, x, x)

    return out.reshape(B, H * C, L)


def qkv_attention_reference(qkv, num_heads):
    """Pure-JAX reference mirroring the PyTorch forward."""
    B, width, L = qkv.shape
    C = width // (3 * num_heads)
    q, k, v = jnp.split(qkv, 3, axis=1)
    scale = 1.0 / math.sqrt(math.sqrt(C))
    qh = (q * scale).reshape(B * num_heads, C, L)
    kh = (k * scale).reshape(B * num_heads, C, L)
    vh = v.reshape(B * num_heads, C, L)
    w = jnp.einsum('bct,bcs->bts', qh, kh)
    w = jax.nn.softmax(w.astype(jnp.float32), axis=-1).astype(w.dtype)
    a = jnp.einsum('bts,bcs->bct', w, vh)
    return a.reshape(B, -1, L)


if __name__ == "__main__":
    # small shapes: batch=2, heads=2, channels-per-head=8, length=16
    B, H, C, L = 2, 2, 8, 16
    width = 3 * H * C  # 48
    key = jax.random.PRNGKey(0)
    qkv = jax.random.normal(key, (B, width, L), dtype=jnp.float32)

    ref = qkv_attention_reference(qkv, num_heads=H)

    # Exact path (f32 matmuls): tight check against the reference.
    f32_fn = jax.jit(functools.partial(qkv_attention, num_heads=H,
                                       matmul_dtype=None))
    out_f32 = jax.block_until_ready(f32_fn(qkv))
    assert out_f32.shape == (B, H * C, L)
    err = float(jnp.max(jnp.abs(out_f32 - ref)))
    assert jnp.allclose(out_f32, ref, atol=1e-4, rtol=1e-4), (
        f"f32 path mismatch vs reference: max abs err {err:.3e}")

    # Default path (bf16 MXU, f32 softmax): loose bf16-quantization bound.
    bf16_fn = jax.jit(functools.partial(qkv_attention, num_heads=H))
    out_bf16 = jax.block_until_ready(bf16_fn(qkv))
    assert out_bf16.shape == (B, H * C, L)
    err_bf = float(jnp.max(jnp.abs(out_bf16 - ref)))
    assert jnp.allclose(out_bf16, ref, atol=1e-1, rtol=1e-1), (
        f"bf16 path mismatch vs reference: max abs err {err_bf:.3e}")

    print("KERNEL_OK")
</pallas_src>

<mosaic_0001>
module attributes {stable_mosaic.version = 11 : i64} {
  func.func @_attn_kernel(%arg0: i32, %arg1: i32, %arg2: i32, %arg3: memref<1x1x2x8x16xf32, #tpu.memory_space<vmem>>, %arg4: memref<1x1x2x8x16xf32, #tpu.memory_space<vmem>>, %arg5: memref<1x1x2x8x16xf32, #tpu.memory_space<vmem>>, %arg6: memref<1x2x8x16xf32, #tpu.memory_space<vmem>>) attributes {dimension_semantics = [#tpu.dimension_semantics<parallel>, #tpu.dimension_semantics<parallel>, #tpu.dimension_semantics<arbitrary>], iteration_bounds = array<i64: 2, 1, 1>, scalar_prefetch = 0 : i64, scratch_operands = 0 : i64, tpu.core_type = #tpu.core_type<tc>, window_params = [{transform_indices = @transform_0, window_bounds = array<i64: 1, 1, 2, 8, 16>}, {transform_indices = @transform_1, window_bounds = array<i64: 1, 1, 2, 8, 16>}, {transform_indices = @transform_2, window_bounds = array<i64: 1, 1, 2, 8, 16>}, {transform_indices = @transform_3, window_bounds = array<i64: 1, 2, 8, 16>}]} {
    %c0 = arith.constant 0 : index
    %c0_0 = arith.constant 0 : index
    %c0_1 = arith.constant 0 : index
    %c0_2 = arith.constant 0 : index
    %c0_3 = arith.constant 0 : index
    %0 = vector.load %arg3[%c0, %c0_0, %c0_1, %c0_2, %c0_3] : memref<1x1x2x8x16xf32, #tpu.memory_space<vmem>>, vector<1x1x2x8x16xf32>
    %1 = vector.shape_cast %0 : vector<1x1x2x8x16xf32> to vector<2x8x16xf32>
    %c0_4 = arith.constant 0 : index
    %c0_5 = arith.constant 0 : index
    %c0_6 = arith.constant 0 : index
    %c0_7 = arith.constant 0 : index
    %c0_8 = arith.constant 0 : index
    %2 = vector.load %arg4[%c0_4, %c0_5, %c0_6, %c0_7, %c0_8] : memref<1x1x2x8x16xf32, #tpu.memory_space<vmem>>, vector<1x1x2x8x16xf32>
    %3 = vector.shape_cast %2 : vector<1x1x2x8x16xf32> to vector<2x8x16xf32>
    %c0_9 = arith.constant 0 : index
    %c0_10 = arith.constant 0 : index
    %c0_11 = arith.constant 0 : index
    %c0_12 = arith.constant 0 : index
    %c0_13 = arith.constant 0 : index
    %4 = vector.load %arg5[%c0_9, %c0_10, %c0_11, %c0_12, %c0_13] : memref<1x1x2x8x16xf32, #tpu.memory_space<vmem>>, vector<1x1x2x8x16xf32>
    %5 = vector.shape_cast %4 : vector<1x1x2x8x16xf32> to vector<2x8x16xf32>
    %cst = arith.constant 0.353553385 : f32
    %6 = vector.broadcast %cst : f32 to vector<2x8x16xf32>
    %7 = arith.mulf %1, %6 : vector<2x8x16xf32>
    %cst_14 = arith.constant dense<0.000000e+00> : vector<2x16x16xf32>
    %8 = tpu.matmul %7, %3, %cst_14 {dimension_numbers = #tpu.dot_dimension_numbers<[1], [1], [2], [2], [0, 0, 0, 2, 1, 2], [0], [0]>} : vector<2x8x16xf32>, vector<2x8x16xf32>, vector<2x16x16xf32> -> vector<2x16x16xf32>
    %cst_15 = arith.constant dense<0xFF800000> : vector<2x16xf32>
    %9 = vector.multi_reduction <maximumf>, %8, %cst_15 [2] : vector<2x16x16xf32> to vector<2x16xf32>
    %10 = vector.shape_cast %9 : vector<2x16xf32> to vector<2x16x1xf32>
    %11 = vector.broadcast %10 : vector<2x16x1xf32> to vector<2x16x16xf32>
    %12 = arith.subf %8, %11 : vector<2x16x16xf32>
    %13 = math.exp %12 : vector<2x16x16xf32>
    %cst_16 = arith.constant dense<0.000000e+00> : vector<2x16xf32>
    %14 = vector.multi_reduction <add>, %13, %cst_16 [2] : vector<2x16x16xf32> to vector<2x16xf32>
    %cst_17 = arith.constant dense<0.000000e+00> : vector<2x8x16xf32>
    %15 = tpu.matmul %5, %13, %cst_17 {dimension_numbers = #tpu.dot_dimension_numbers<[2], [2], [1], [1], [0, 0, 0, 1, 1, 1], [0], [0]>} : vector<2x8x16xf32>, vector<2x16x16xf32>, vector<2x8x16xf32> -> vector<2x8x16xf32>
    %16 = tpu.reciprocal %14 : vector<2x16xf32> -> vector<2x16xf32>
    %17 = vector.shape_cast %16 : vector<2x16xf32> to vector<2x1x16xf32>
    %18 = vector.broadcast %17 : vector<2x1x16xf32> to vector<2x8x16xf32>
    %19 = arith.mulf %15, %18 : vector<2x8x16xf32>
    %c0_18 = arith.constant 0 : index
    %c0_19 = arith.constant 0 : index
    %c0_20 = arith.constant 0 : index
    %c0_21 = arith.constant 0 : index
    %20 = vector.load %arg6[%c0_18, %c0_19, %c0_20, %c0_21] : memref<1x2x8x16xf32, #tpu.memory_space<vmem>>, vector<1x2x8x16xf32>
    %21 = vector.shape_cast %20 : vector<1x2x8x16xf32> to vector<2x8x16xf32>
    %22 = vector.shape_cast %19 : vector<2x8x16xf32> to vector<1x2x8x16xf32>
    tpu.vector_store %arg6[%c0_18, %c0_19, %c0_20, %c0_21], %22 {strides = array<i32>} : memref<1x2x8x16xf32, #tpu.memory_space<vmem>>, vector<1x2x8x16xf32>,
    return
  }
  func.func @transform_0(%arg0: i32, %arg1: i32, %arg2: i32) -> (i32, i32, i32, i32, i32) {
    %c0_i32 = arith.constant 0 : i32
    %c0_i32_0 = arith.constant 0 : i32
    %c0_i32_1 = arith.constant 0 : i32
    return %arg0, %c0_i32, %arg1, %c0_i32_0, %arg2 : i32, i32, i32, i32, i32
  }
  func.func @transform_1(%arg0: i32, %arg1: i32, %arg2: i32) -> (i32, i32, i32, i32, i32) {
    %c1_i32 = arith.constant 1 : i32
    %c0_i32 = arith.constant 0 : i32
    %c0_i32_0 = arith.constant 0 : i32
    %c0_i32_1 = arith.constant 0 : i32
    return %arg0, %c1_i32, %arg1, %c0_i32, %c0_i32_0 : i32, i32, i32, i32, i32
  }
  func.func @transform_2(%arg0: i32, %arg1: i32, %arg2: i32) -> (i32, i32, i32, i32, i32) {
    %c2_i32 = arith.constant 2 : i32
    %c0_i32 = arith.constant 0 : i32
    %c0_i32_0 = arith.constant 0 : i32
    %c0_i32_1 = arith.constant 0 : i32
    return %arg0, %c2_i32, %arg1, %c0_i32, %c0_i32_0 : i32, i32, i32, i32, i32
  }
  func.func @transform_3(%arg0: i32, %arg1: i32, %arg2: i32) -> (i32, i32, i32, i32) {
    %c0_i32 = arith.constant 0 : i32
    %c0_i32_0 = arith.constant 0 : i32
    return %arg0, %arg1, %c0_i32, %arg2 : i32, i32, i32, i32
  }
}

</mosaic_0001>

<bundles_post_ra>
// kernel: qkv_attention.1
= control target key start
LH: loop header
LB: loop body
LE: loop exit
PB: predicated region body
PF: predicated region fallthrough
CT: control target
= control target key end

     0   :  { %8 = vsyncpa [#allocation3], 0  ;;  %s1124_s0 = inlined_call_operand.vmem [shape: f32[2,3,2,8,16], index: 0, kind: input, shape index: {}, may-alias: {0,1,2}]   ;;  %s1125_s1 = inlined_call_operand.vmem [shape: f32[2,3,2,8,16], index: 1, kind: input, shape index: {}, may-alias: {0,1,2}]   ;;  %s1126_s2 = inlined_call_operand.vmem [shape: f32[2,3,2,8,16], index: 2, kind: input, shape index: {}, may-alias: {0,1,2}]   ;;  %s1127_s3 = inlined_call_operand.hbm [shape: f32[2,2,8,16], index: 3, kind: output, shape index: {}]  }
   0x1   :  { %10 = vsyncpa [#allocation3 + $0x1], 0  ;;  %s971_s12 = smov 0   ;;  %s973_s13 = smov 0  }
   0x2   :  { %s975_s14 = smov 0   ;;  %s977_s15 = smov 0  }
   0x3   :  { %s979_s16 = smov 0   ;;  %s981_s17 = smov 0  }
   0x4 LB: > { %s765_s18 = sadd.s32 4294967295, %s947_s17   ;;  %s766_s19 = sadd.s32 4294967294, %s947_s17   ;;  %s947_s17 = sphi %s981_s17, %s16_s17   ;;  %s943_s16 = sphi %s979_s16, %s1136_s16   ;;  %s939_s15 = sphi %s977_s15, %s1135_s15   ;;  %s935_s14 = sphi %s975_s14, %s1134_s14   ;;  %s931_s13 = sphi %s973_s13, %s1133_s13   ;;  %s927_s12 = sphi %s971_s12, %s1132_s12  }
   0x5   : > { %s35_s20 = sadd.s32 1, %s943_s16  ;;  %s132_s21 = sadd.s32 1, %s935_s14 }
   0x6   : > { %p37_p0 = scmp.ge.s32.totalorder %s35_s20, 2  ;;  %p142_p1 = scmp.ne.s32.totalorder %s935_s14, %s931_s13 }
   0x7   : > { %p143_p2 = scmp.eq.s32.totalorder %s765_s18, 1  ;;  %p148_p3 = scmp.ne.s32.totalorder %s931_s13, %s927_s12 }
   0x8   : > { %s1138_s20 = smov (%p37_p0, %s35_s20), 0  ;;  %p149_p5 = scmp.eq.s32.totalorder %s766_s19, 1 }
   0x9   : > { %p1011_p4 = por %p143_p2, %p142_p1  ;;  %s125_s23 = ssub.s32 %s943_s16, %s1138_s20 }
   0xa   : > { %p769_p6 = scmp.ge.s32.totalorder %s947_s17, 1  ;;  %p130_p7 = scmp.eq.s32.totalorder %s125_s23, 0 }
   0xb   : > { %p1018_p8 = por %p149_p5, %p148_p3  ;;  %p211_p9 = scmp.lt.s32.totalorder %s947_s17, 3 }
   0xc   : > { %s1024_s25 = scalar_select %p130_p7, %s935_s14, %s132_s21  }
   0xd   : > { %p212_p10 = pnand %p769_p6, %p211_p9 }
   0xe   : > { %p263_p11 = scmp.lt.s32.totalorder (!%p212_p10), %s939_s15, 1  ;;  %s259_s10 = sand.u32 (!%p212_p10), 1, %s931_s13  }
   0xf   : > { %215 = sbr.rel (%p212_p10) target bundleno = 616 (0x268), region = 32  ;;  %s770_s11 = sshll.u32 (!%p212_p10), %s259_s10, 4 }
  0x10   : > { %s1074_s18 = scalar_lea.vmem (!%p212_p10), [#allocation2], %s770_s11  ;;  %s793_s19 = sshll.u32 (!%p212_p10), %s939_s15, 4 }
  0x11   : > { %s619_s28 = scalar_lea.sflag (!%p212_p10), [#allocation3], %s259_s10 }
  0x14   : > { %s264_s26 = scalar_select %p263_p11, %s939_s15, 1  ;;  %vm338_vm0 = vcmask 64512   ;;  %vm429_vm1 = vcmask 130048   ;;  %v584_v49 = vlaneseq  ;;  %vm589_vm10 = vcmask 130112  }
  0x16   : > { %s1028_s27 = smul.u32 48, %s264_s26  ;;  %v1063_v58 = vand.u32 127, %v584_v49  ;;  %s633_s26 = scalar_lea.hbm %s1127_s3, %s793_s19 }
  0x17   : > { %s636_s15 = sshll.u32 %s633_s26, 4  ;;  %s637_s15 = int_to_ptr.hbm [resolvable:$true] %s636_s15 }
  0x18   : > { %s273_s30 = scalar_lea.vmem %s1124_s0, %s1028_s27  ;;  %s702_s6 = scalar_lea.vmem %s1125_s1, %s1028_s27  ;;  %v587_v63 = vadd.s32 4294967288, %v1063_v58 }
  0x19   : > { %v298_v0 = vld [vmem:[%s273_s30] sm:$0xff]  ;;  %v774_v1 = vld [vmem:[%s702_s6 + $0x10] sm:$0xff]  ;;  %v299_v3 = vld [vmem:[%s273_s30 + $0x8] sm:$0xff]  ;;  %s707_s9 = scalar_lea.vmem %s1126_s2, %s1028_s27  ;;  %s634_s27 = sshll.u32 %s1074_s18, 4  ;;  %s635_s27 = int_to_ptr.vmem [resolvable:$true] %s634_s27 }
  0x1a   : > { %v304_v2 = vmul.f32 0.35355338, %v298_v0  ;;  %360 = vmatpush.msra.mxu0 %v774_v1  ;;  %v305_v4 = vmul.f32 0.35355338, %v299_v3  ;;  %v775_v5 = vld [vmem:[%s702_s6 + $0x18] sm:$0xff]  ;;  %v776_v32 = vld [vmem:[%s707_s9 + $0x20] sm:$0xff] }
  0x1b   : > { %421 = vmatpush.msra.mxu1 %v775_v5  ;;  %v777_v39 = vld [vmem:[%s707_s9 + $0x28] sm:$0xff]  ;;  %s883_s29 = sshra.s32 %s637_s15, 4  ;;  %s889_s6 = scalar_lea.hbm %s1127_s3, 32  ;;  %s884_s29 = int_to_ptr.hbm [resolvable:$true] %s883_s29 }
  0x1c   : > { %306 = vxpose.xlu0.b32.start.end [1/1] (short) (narrow) %v304_v2, 16  ;;  %s885_s30 = scalar_lea.hbm %s884_s29, 16  ;;  %p890_p1 = scmp.lt.s32.totalorder %s884_s29, %s1127_s3 }
  0x1d   : > { %p886_p12 = scmp.ne.s32.totalorder %s884_s29, %s885_s30  ;;  %p891_p2 = scmp.lt.s32.totalorder %s889_s6, %s885_s30 }
  0x1f   : > { %p887_p13 = pnand %p886_p12, %p1011_p4  ;;  %p892_p3 = por %p891_p2, %p890_p1 }
  0x21   : > { %p888_p0 = pneg %p887_p13 }
  0x23   : > { %p893_p5 = pnand %p892_p3, %p888_p0 }
  0x2c   : > { %368 = vxpose.xlu0.b32.start.end [1/1] (short) (narrow) %v305_v4, 16 }
  0xc0   : > { %v322_v6 = vpop.trf.xlu0 }
  0xc1   : > { %778 = vmatmul.msk.f32.vlgmr.msra.gmra.mxu0 %vm338_vm0, %v322_v6 }
  0xc8   : > { %v323_v7 = vpop.trf.xlu0 }
  0xc9   : > { %779 = vmatmul.msk.f32.gmra.mxu0 %vm338_vm0, %v323_v7 }
  0xd0   : > { %v384_v8 = vpop.trf.xlu0 }
  0xd1   : > { %780 = vmatmul.msk.f32.vlgmr.msra.gmra.mxu1 %vm338_vm0, %v384_v8 }
  0xd8   : > { %v385_v9 = vpop.trf.xlu0 }
  0xd9   : > { %781 = vmatmul.msk.f32.gmra.mxu1 %vm338_vm0, %v385_v9 }
 0x13e   : > { %v362_v10 = vpop.f32.mrf.mxu0 }
 0x13f   : > { %v430_v11 = vsel %vm429_vm1, %v362_v10, -inf }
 0x140   : > { %431 = vmax.xlane.f32.xlu2 %v430_v11 }
 0x146   : > { %v365_v12 = vpop.f32.mrf.mxu0 }
 0x147   : > { %v433_v13 = vsel %vm429_vm1, %v365_v12, -inf }
 0x148   : > { %434 = vmax.xlane.f32.xlu1 %v433_v13 }
 0x14e   : > { %v423_v14 = vpop.f32.mrf.mxu1 }
 0x14f   : > { %v436_v15 = vsel %vm429_vm1, %v423_v14, -inf }
 0x150   : > { %437 = vmax.xlane.f32.xlu2 %v436_v15 }
 0x156   : > { %v426_v16 = vpop.f32.mrf.mxu1 }
 0x157   : > { %v439_v17 = vsel %vm429_vm1, %v426_v16, -inf }
 0x158   : > { %440 = vmax.xlane.f32.xlu1 %v439_v17 }
 0x1b3   : > { %v432_v18 = vpop.xlane.xlu2 %431 }
 0x1b4   : > { %v442_v19 = vsub.f32 %v362_v10, %v432_v18 }
 0x1b6   : > { %v446_v20 = vmul.f32 1.442695, %v442_v19 }
 0x1b8   : > { %853 = vpow2.f32 %v446_v20 }
 0x1bb   : > { %v435_v21 = vpop.xlane.xlu1 %434 }
 0x1bc   : > { %v443_v22 = vsub.f32 %v365_v12, %v435_v21 }
 0x1be   : > { %v854_v23 = vpop.eup %853  ;;  %v448_v24 = vmul.f32 1.442695, %v443_v22 }
 0x1bf   : > { %v454_v25 = vsel %vm429_vm1, %v854_v23, 0.0 }
 0x1c0   : > { %855 = vpow2.f32 %v448_v24  ;;  %455 = vadd.xlane.f32.xlu1 %v454_v25 }
 0x1c3   : > { %v438_v26 = vpop.xlane.xlu2 %437 }
 0x1c4   : > { %v444_v27 = vsub.f32 %v423_v14, %v438_v26 }
 0x1c6   : > { %v856_v28 = vpop.eup %855  ;;  %v450_v29 = vmul.f32 1.442695, %v444_v27 }
 0x1c7   : > { %782 = vmatpush.xpose.msk.msra.mxu2 %vm429_vm1, %v856_v28  ;;  %v457_v30 = vsel %vm429_vm1, %v856_v28, 0.0 }
 0x1c8   : > { %857 = vpow2.f32 %v450_v29  ;;  %458 = vadd.xlane.f32.xlu2 %v457_v30 }
 0x1cb   : > { %783 = vmatpush.xpose.msk.msra.mxu2 %vm429_vm1, %v854_v23  ;;  %v441_v31 = vpop.xlane.xlu1 %440 }
 0x1cc   : > { %v445_v33 = vsub.f32 %v426_v16, %v441_v31 }
 0x1ce   : > { %v858_v34 = vpop.eup %857  ;;  %v452_v35 = vmul.f32 1.442695, %v445_v33  ;;  %784 = vmatmul.msk.f32.vlgmr.msra.gmra.mxu2 %vm429_vm1, %v776_v32 }
 0x1cf   : > { %v460_v36 = vsel %vm429_vm1, %v858_v34, 0.0 }
 0x1d0   : > { %859 = vpow2.f32 %v452_v35  ;;  %461 = vadd.xlane.f32.xlu0 %v460_v36 }
 0x1d6   : > { %v860_v37 = vpop.eup %859 }
 0x1d7   : > { %785 = vmatpush.xpose.msk.msra.mxu3 %vm429_vm1, %v860_v37  ;;  %v463_v38 = vsel %vm429_vm1, %v860_v37, 0.0 }
 0x1d8   : > { %464 = vadd.xlane.f32.xlu1 %v463_v38 }
 0x1db   : > { %786 = vmatpush.xpose.msk.msra.mxu3 %vm429_vm1, %v858_v34 }
 0x1de   : > { %787 = vmatmul.msk.f32.vlgmr.msra.gmra.mxu3 %vm429_vm1, %v777_v39 }
 0x233   : > { %v456_v40 = vpop.xlane.xlu1 %455 }
 0x234   : > { %861 = vrcp.f32 %v456_v40  ;;  %vm529_vm3 = vweird.f32 %v456_v40  ;;  %v535_v52 = vand.u32 2147483648, %v456_v40  ;;  %v533_v53 = vand.u32 2147483647, %v456_v40 }
 0x236   : > { %v536_v62 = vor.u32 1.1754944e-38, %v535_v52  ;;  %vm534_vm8 = vcmp.eq.f32.partialorder %v533_v53, 8.507059e+37 }
 0x23a   : > { %v862_v41 = vpop.eup %861 }
 0x23b   : > { %v525_v42 = vmul.f32 %v862_v41, %v456_v40  ;;  %v459_v43 = vpop.xlane.xlu2 %458  ;;  %vm530_vm2 = vweird.f32 %v862_v41 }
 0x23c   : > { %863 = vrcp.f32 %v459_v43  ;;  %v549_v55 = vand.u32 2147483648, %v459_v43  ;;  %vm1059_vm5 = vmor %vm529_vm3, %vm530_vm2  ;;  %v547_v57 = vand.u32 2147483647, %v459_v43  ;;  %vm543_vm6 = vweird.f32 %v459_v43 }
 0x23d   : > { %v526_v44 = vsub.f32 1.0, %v525_v42 }
 0x23e   : > { %v550_v1 = vor.u32 1.1754944e-38, %v549_v55  ;;  %vm548_vm9 = vcmp.eq.f32.partialorder %v547_v57, 8.507059e+37 }
 0x23f   : > { %v527_v45 = vmul.f32 %v862_v41, %v526_v44 }
 0x241   : > { %v528_v50 = vadd.f32 %v862_v41, %v527_v45 }
 0x242   : > { %v864_v46 = vpop.eup %863 }
 0x243   : > { %v539_v47 = vmul.f32 %v864_v46, %v459_v43  ;;  %v1056_v48 = vpop.xlane.xlu0 %461  ;;  %vm544_vm4 = vweird.f32 %v864_v46  ;;  %v532_v60 = vsel %vm1059_vm5, %v862_v41, %v528_v50 }
 0x244   : > { %865 = vrcp.f32 %v1056_v48  ;;  %vm545_vm7 = vmor %vm543_vm6, %vm544_vm4  ;;  %v537_v4 = vsel %vm534_vm8, %v536_v62, %v532_v60  ;;  %vm557_vm12 = vweird.f32 %v1056_v48  ;;  %v563_v17 = vand.u32 2147483648, %v1056_v48 }
 0x245   : > { %v540_v51 = vsub.f32 1.0, %v539_v47  ;;  %v586_v8 = vperm.slane %v537_v4, %v1063_v58  ;;  %v561_v19 = vand.u32 2147483647, %v1056_v48 }
 0x246   : > { %v564_v24 = vor.u32 1.1754944e-38, %v563_v17 }
 0x247   : > { %v541_v54 = vmul.f32 %v864_v46, %v540_v51  ;;  %vm562_vm2 = vcmp.eq.f32.partialorder %v561_v19, 8.507059e+37 }
 0x249   : > { %v542_v59 = vadd.f32 %v864_v46, %v541_v54 }
 0x24a   : > { %v866_v61 = vpop.eup %865 }
 0x24b   : > { %v546_v0 = vsel %vm545_vm7, %v864_v46, %v542_v59  ;;  %v553_v2 = vmul.f32 %v866_v61, %v1056_v48  ;;  %v465_v3 = vpop.xlane.xlu1 %464  ;;  %vm558_vm11 = vweird.f32 %v866_v61 }
 0x24c   : > { %867 = vrcp.f32 %v465_v3  ;;  %v551_v6 = vsel %vm548_vm9, %v550_v1, %v546_v0  ;;  %v577_v18 = vand.u32 2147483648, %v465_v3  ;;  %v575_v21 = vand.u32 2147483647, %v465_v3  ;;  %vm559_vm14 = vmor %vm557_vm12, %vm558_vm11 }
 0x24d   : > { %v554_v5 = vsub.f32 1.0, %v553_v2  ;;  %v588_v7 = vperm.slane %v551_v6, %v587_v63  ;;  %vm571_vm15 = vweird.f32 %v465_v3 }
 0x24e   : > { %v578_v25 = vor.u32 1.1754944e-38, %v577_v18  ;;  %vm576_vm3 = vcmp.eq.f32.partialorder %v575_v21, 8.507059e+37 }
 0x24f   : > { %v555_v9 = vmul.f32 %v866_v61, %v554_v5  ;;  %v590_v11 = vsel %vm589_vm10, %v588_v7, %v586_v8 }
 0x251   : > { %v492_v10 = vpop.f32.mrf.mxu2  ;;  %v556_v15 = vadd.f32 %v866_v61, %v555_v9 }
 0x252   : > { %v868_v12 = vpop.eup %867  ;;  %v614_v13 = vmul.f32 %v590_v11, %v492_v10 }
 0x253   : > { %v567_v14 = vmul.f32 %v868_v12, %v465_v3  ;;  %vm572_vm13 = vweird.f32 %v868_v12  ;;  %v560_v22 = vsel %vm559_vm14, %v866_v61, %v556_v15 }
 0x254   : > { %616 = vst.msk [vmem:[%s1074_s18] sm:$0xff] %vm429_vm1, %v614_v13  ;;  %vm573_vm0 = vmor %vm571_vm15, %vm572_vm13  ;;  %v565_v27 = vsel %vm562_vm2, %v564_v24, %v560_v22 }
 0x255   : > { %v568_v16 = vsub.f32 1.0, %v567_v14  ;;  %v591_v30 = vperm.slane %v565_v27, %v1063_v58 }
 0x257   : > { %v569_v20 = vmul.f32 %v868_v12, %v568_v16 }
 0x259   : > { %v570_v23 = vadd.f32 %v868_v12, %v569_v20 }
 0x25b   : > { %v574_v26 = vsel %vm573_vm0, %v868_v12, %v570_v23 }
 0x25c   : > { %v579_v28 = vsel %vm576_vm3, %v578_v25, %v574_v26 }
 0x25d   : > { %v592_v29 = vperm.slane %v579_v28, %v587_v63 }
 0x25f   : > { %v593_v32 = vsel %vm589_vm10, %v592_v29, %v591_v30 }
 0x261   : > { %v521_v31 = vpop.f32.mrf.mxu3 }
 0x262   : > { %v615_v33 = vmul.f32 %v593_v32, %v521_v31 }
 0x264   : > { %617 = vst.msk [vmem:[%s1074_s18 + $0x8] sm:$0xff] %vm429_vm1, %v615_v33 }
 0x265   : > { %896 = shalt.err (!%p893_p5)
}
 0x266   : > { %s949_s9 = smov 128   ;;  %s950_s10 = smov 8  }
 0x267   : > { %795 = dma.vmem_to_hbm [thread:$0]  (%p1011_p4), %s635_s27, 256, %s637_s15, %s619_s28, %s949_s9, %s949_s9, %s950_s10  }
 0x268 PF: > { %p801_p6 = scmp.ge.s32.totalorder %s947_s17, 2  ;;  %s651_s11 = sand.u32 1, %s927_s12  }
 0x269   : > { %s652_s18 = scalar_lea.sflag [#allocation3], %s651_s11 }
 0x26a   : > { %p798_p7 = pnand %p801_p6, %p1018_p8 }
 0x26c   : > { %p799_p9 = pneg %p798_p7 }
 0x26e   : > { %922 = dma.done.wait (%p799_p9), %s652_s18, 256  }
 0x26f   : > { %924 = vsyncadd (%p799_p9), %s652_s18, 4294967040  ;;  %s16_s17 = sadd.s32 1, %s947_s17   ;;  %s1132_s12 = smov %s931_s13 }
 0x270   : > { %p13_p10 = scmp.ge.s32.totalorder %s16_s17, 4   ;;  %s1133_s13 = smov %s935_s14 }
 0x271   : > { %s1134_s14 = smov %s1024_s25  ;;  %s1135_s15 = smov %s943_s16 }
 0x272   : > { %s1136_s16 = smov %s1138_s20  ;;  %15 = sbr.rel (!%p13_p10) target bundleno = 4 (0x4), region = 73 }
 0x277   :  { %658 = vsyncpa [#allocation3], 1 }
 0x278   :  { %660 = vsyncpa [#allocation3 + $0x1], 1 }

</bundles_post_ra>
